<compile_context>
chip_gen: v7x
topology: tpu7x:2x2x1
jax: 0.10.0
libtpu: 0.0.40
codegen_flags: <defaults>
</compile_context>

<pallas_src>
import jax
import jax.numpy as jnp
from jax.experimental import pallas as pl
from jax.experimental.pallas import tpu as pltpu


def _round_up(n, m):
    return ((n + m - 1) // m) * m


def property_model_kernel(x_ref, w0_ref, b0_ref, w1_ref, b1_ref,
                          w2_ref, b2_ref, o_ref):
    """3 matmuls (bf16 operands, f32 accumulation) + ReLU + stable softmax."""
    x = x_ref[...]

    # Linear(input_dim, h0) + ReLU   (elementwise kept in f32)
    h = jnp.dot(x, w0_ref[...], preferred_element_type=jnp.float32) + b0_ref[...]
    h = jnp.maximum(h, 0.0)

    # Linear(h0, h1) + ReLU
    h = jnp.dot(h.astype(w1_ref.dtype), w1_ref[...],
                preferred_element_type=jnp.float32) + b1_ref[...]
    h = jnp.maximum(h, 0.0)

    # Linear(h1, output_dim_padded)
    logits = jnp.dot(h.astype(w2_ref.dtype), w2_ref[...],
                     preferred_element_type=jnp.float32) + b2_ref[...]

    # Numerically-stable softmax over the feature axis (== torch Softmax(dim=1)).
    # Padded columns carry a -1e30 bias -> exp underflows to exactly 0, so they
    # contribute nothing to the denominator and the real columns are unchanged.
    m = jnp.max(logits, axis=-1, keepdims=True)
    e = jnp.exp(logits - m)
    denom = jnp.sum(e, axis=-1, keepdims=True)
    o_ref[...] = e * pl.reciprocal(denom, approx=True)   # EUP slot, not VALU divide


def property_model_forward(x, params, *, tb=None, compute_dtype=jnp.bfloat16):
    """Run the MLP+softmax.

    x: (B, input_dim) f32.
    params: [(W0,b0),(W1,b1),(W2,b2)] with W as (in_features, out_features)
            (transposed vs. nn.Linear) and b as (1, out_features).
    """
    (w0, b0), (w1, b1), (w2, b2) = params
    B, D = x.shape
    O = w2.shape[1]

    # --- lane-dense output: pad out-features to a multiple of 128 -------------
    Op = _round_up(O, 128)
    if Op != O:
        w2 = jnp.zeros((w2.shape[0], Op), w2.dtype).at[:, :O].set(w2)
        b2 = jnp.full((1, Op), -1e30, jnp.float32).at[:, :O].set(b2)

    # --- batch tiling ----------------------------------------------------------
    if tb is None:
        # MXU-filling tiles (multiple of 256 on v6e/v7x, 128 on v5e) for large
        # batches; a single grid step for small batches.
        tb = 512 if B >= 1024 else _round_up(max(B, 8), 8)
    Bp = _round_up(B, tb)
    if Bp != B:
        x = jnp.zeros((Bp, D), x.dtype).at[:B].set(x)

    # --- dtypes: bf16 MXU operands, f32 accumulation & epilogue ---------------
    x = x.astype(compute_dtype)
    w0, w1, w2 = (w.astype(compute_dtype) for w in (w0, w1, w2))
    b0, b1, b2 = (b.astype(jnp.float32) for b in (b0, b1, b2))

    grid = (Bp // tb,)

    def rep(shape):
        # Grid-invariant block: same index every step -> no re-fetch after step 0.
        return pl.BlockSpec(shape, lambda i: (0, 0))

    out = pl.pallas_call(
        property_model_kernel,
        out_shape=jax.ShapeDtypeStruct((Bp, Op), jnp.float32),
        grid=grid,
        in_specs=[
            pl.BlockSpec((tb, D), lambda i: (i, 0)),      # x tile
            rep(w0.shape), rep(b0.shape),
            rep(w1.shape), rep(b1.shape),
            rep(w2.shape), rep(b2.shape),
        ],
        out_specs=pl.BlockSpec((tb, Op), lambda i: (i, 0)),
        compiler_params=pltpu.CompilerParams(
            dimension_semantics=("parallel",)),            # megacore-shardable
    )(x, w0, b0, w1, b1, w2, b2)

    return out[:B, :O]


def init_params(key, input_dim, hidden_layer_shapes, output_dim):
    """Deterministic synthetic init (Kaiming-ish uniform like nn.Linear)."""
    dims = [input_dim] + list(hidden_layer_shapes) + [output_dim]
    params = []
    for fan_in, fan_out in zip(dims[:-1], dims[1:]):
        key, kw, kb = jax.random.split(key, 3)
        bound = 1.0 / jnp.sqrt(fan_in)
        w = jax.random.uniform(kw, (fan_in, fan_out), jnp.float32, -bound, bound)
        b = jax.random.uniform(kb, (1, fan_out), jnp.float32, -bound, bound)
        params.append((w, b))
    return params


def reference_forward(x, params, compute_dtype=jnp.bfloat16):
    """Pure-JAX reference mirroring the PyTorch sequential, with the same
    bf16-operand / f32-accumulation matmul convention as the kernel."""
    (w0, b0), (w1, b1), (w2, b2) = params
    c = lambda a: a.astype(compute_dtype)
    h = jnp.dot(c(x), c(w0), preferred_element_type=jnp.float32) + b0
    h = jnp.maximum(h, 0.0)
    h = jnp.dot(c(h), c(w1), preferred_element_type=jnp.float32) + b1
    h = jnp.maximum(h, 0.0)
    logits = jnp.dot(c(h), c(w2), preferred_element_type=jnp.float32) + b2
    return jax.nn.softmax(logits, axis=1)


if __name__ == "__main__":
    # PropertyModel(input_dim=32, output_dim=8, num_hidden_layers=2,
    #               hidden_layer_shapes=[64, 48], activation_cls=ReLU)
    batch, input_dim, hidden, output_dim = 16, 32, [64, 48], 8

    key = jax.random.PRNGKey(0)
    key, kx = jax.random.split(key)
    x = jax.random.normal(kx, (batch, input_dim), jnp.float32)
    params = init_params(key, input_dim, hidden, output_dim)

    # Small batch: single grid step (whole batch in one invocation).
    out = jax.block_until_ready(property_model_forward(x, params))
    ref = reference_forward(x, params)
    assert out.shape == (batch, output_dim)
    assert jnp.allclose(out, ref, atol=2e-3), "mismatch vs reference (small batch)"
    assert jnp.allclose(jnp.sum(out, axis=1), jnp.ones((batch,)), atol=2e-3)

    # Larger, ragged batch: exercises the tiled path (tb=512, grid>1, batch pad).
    key, kx2 = jax.random.split(key)
    big_batch = 1024 + 40
    x_big = jax.random.normal(kx2, (big_batch, input_dim), jnp.float32)
    out_big = jax.block_until_ready(property_model_forward(x_big, params, tb=512))
    ref_big = reference_forward(x_big, params)
    assert out_big.shape == (big_batch, output_dim)
    assert jnp.allclose(out_big, ref_big, atol=2e-3), "mismatch vs reference (tiled)"
    assert jnp.allclose(jnp.sum(out_big, axis=1), jnp.ones((big_batch,)), atol=2e-3)

    print("KERNEL_OK")
</pallas_src>

<mosaic_0001>
module attributes {stable_mosaic.version = 11 : i64} {
  func.func @property_model_kernel(%arg0: i32, %arg1: memref<16x32xbf16, #tpu.memory_space<vmem>>, %arg2: memref<32x64xbf16, #tpu.memory_space<vmem>>, %arg3: memref<1x64xf32, #tpu.memory_space<vmem>>, %arg4: memref<64x48xbf16, #tpu.memory_space<vmem>>, %arg5: memref<1x48xf32, #tpu.memory_space<vmem>>, %arg6: memref<48x128xbf16, #tpu.memory_space<vmem>>, %arg7: memref<1x128xf32, #tpu.memory_space<vmem>>, %arg8: memref<16x128xf32, #tpu.memory_space<vmem>>) attributes {dimension_semantics = [#tpu.dimension_semantics<parallel>], iteration_bounds = array<i64: 1>, scalar_prefetch = 0 : i64, scratch_operands = 0 : i64, tpu.core_type = #tpu.core_type<tc>, window_params = [{transform_indices = @transform_0, window_bounds = array<i64: 16, 32>}, {pipeline_mode = #tpu.pipeline_mode<synchronous>, transform_indices = @transform_1, window_bounds = array<i64: 32, 64>}, {pipeline_mode = #tpu.pipeline_mode<synchronous>, transform_indices = @transform_2, window_bounds = array<i64: 1, 64>}, {pipeline_mode = #tpu.pipeline_mode<synchronous>, transform_indices = @transform_3, window_bounds = array<i64: 64, 48>}, {pipeline_mode = #tpu.pipeline_mode<synchronous>, transform_indices = @transform_4, window_bounds = array<i64: 1, 48>}, {pipeline_mode = #tpu.pipeline_mode<synchronous>, transform_indices = @transform_5, window_bounds = array<i64: 48, 128>}, {pipeline_mode = #tpu.pipeline_mode<synchronous>, transform_indices = @transform_6, window_bounds = array<i64: 1, 128>}, {transform_indices = @transform_7, window_bounds = array<i64: 16, 128>}]} {
    %c0 = arith.constant 0 : index
    %c0_0 = arith.constant 0 : index
    %0 = vector.load %arg1[%c0, %c0_0] : memref<16x32xbf16, #tpu.memory_space<vmem>>, vector<16x32xbf16>
    %c0_1 = arith.constant 0 : index
    %c0_2 = arith.constant 0 : index
    %1 = vector.load %arg2[%c0_1, %c0_2] : memref<32x64xbf16, #tpu.memory_space<vmem>>, vector<32x64xbf16>
    %cst = arith.constant dense<0.000000e+00> : vector<16x64xf32>
    %2 = tpu.matmul %0, %1, %cst {dimension_numbers = #tpu.dot_dimension_numbers<[1], [0], [0], [1], [0, 0, 1, 1], [], []>} : vector<16x32xbf16>, vector<32x64xbf16>, vector<16x64xf32> -> vector<16x64xf32>
    %c0_3 = arith.constant 0 : index
    %c0_4 = arith.constant 0 : index
    %3 = vector.load %arg3[%c0_3, %c0_4] : memref<1x64xf32, #tpu.memory_space<vmem>>, vector<1x64xf32>
    %4 = vector.broadcast %3 : vector<1x64xf32> to vector<16x64xf32>
    %5 = arith.addf %2, %4 : vector<16x64xf32>
    %cst_5 = arith.constant 0.000000e+00 : f32
    %6 = vector.broadcast %cst_5 : f32 to vector<16x64xf32>
    %7 = arith.maximumf %5, %6 : vector<16x64xf32>
    %8 = arith.truncf %7 : vector<16x64xf32> to vector<16x64xbf16>
    %c0_6 = arith.constant 0 : index
    %c0_7 = arith.constant 0 : index
    %9 = vector.load %arg4[%c0_6, %c0_7] : memref<64x48xbf16, #tpu.memory_space<vmem>>, vector<64x48xbf16>
    %cst_8 = arith.constant dense<0.000000e+00> : vector<16x48xf32>
    %10 = tpu.matmul %8, %9, %cst_8 {dimension_numbers = #tpu.dot_dimension_numbers<[1], [0], [0], [1], [0, 0, 1, 1], [], []>} : vector<16x64xbf16>, vector<64x48xbf16>, vector<16x48xf32> -> vector<16x48xf32>
    %c0_9 = arith.constant 0 : index
    %c0_10 = arith.constant 0 : index
    %11 = vector.load %arg5[%c0_9, %c0_10] : memref<1x48xf32, #tpu.memory_space<vmem>>, vector<1x48xf32>
    %12 = vector.broadcast %11 : vector<1x48xf32> to vector<16x48xf32>
    %13 = arith.addf %10, %12 : vector<16x48xf32>
    %cst_11 = arith.constant 0.000000e+00 : f32
    %14 = vector.broadcast %cst_11 : f32 to vector<16x48xf32>
    %15 = arith.maximumf %13, %14 : vector<16x48xf32>
    %16 = arith.truncf %15 : vector<16x48xf32> to vector<16x48xbf16>
    %c0_12 = arith.constant 0 : index
    %c0_13 = arith.constant 0 : index
    %17 = vector.load %arg6[%c0_12, %c0_13] : memref<48x128xbf16, #tpu.memory_space<vmem>>, vector<48x128xbf16>
    %cst_14 = arith.constant dense<0.000000e+00> : vector<16x128xf32>
    %18 = tpu.matmul %16, %17, %cst_14 {dimension_numbers = #tpu.dot_dimension_numbers<[1], [0], [0], [1], [0, 0, 1, 1], [], []>} : vector<16x48xbf16>, vector<48x128xbf16>, vector<16x128xf32> -> vector<16x128xf32>
    %c0_15 = arith.constant 0 : index
    %c0_16 = arith.constant 0 : index
    %19 = vector.load %arg7[%c0_15, %c0_16] : memref<1x128xf32, #tpu.memory_space<vmem>>, vector<1x128xf32>
    %20 = vector.broadcast %19 : vector<1x128xf32> to vector<16x128xf32>
    %21 = arith.addf %18, %20 : vector<16x128xf32>
    %cst_17 = arith.constant dense<0xFF800000> : vector<16xf32>
    %22 = vector.multi_reduction <maximumf>, %21, %cst_17 [1] : vector<16x128xf32> to vector<16xf32>
    %23 = vector.shape_cast %22 : vector<16xf32> to vector<16x1xf32>
    %24 = vector.broadcast %23 : vector<16x1xf32> to vector<16x128xf32>
    %25 = arith.subf %21, %24 : vector<16x128xf32>
    %26 = math.exp %25 : vector<16x128xf32>
    %cst_18 = arith.constant dense<0.000000e+00> : vector<16xf32>
    %27 = vector.multi_reduction <add>, %26, %cst_18 [1] : vector<16x128xf32> to vector<16xf32>
    %28 = vector.shape_cast %27 : vector<16xf32> to vector<16x1xf32>
    %29 = tpu.reciprocal %28 {approx = true} : vector<16x1xf32> -> vector<16x1xf32>
    %30 = vector.broadcast %29 : vector<16x1xf32> to vector<16x128xf32>
    %31 = arith.mulf %26, %30 : vector<16x128xf32>
    %c0_19 = arith.constant 0 : index
    %c0_20 = arith.constant 0 : index
    %32 = vector.load %arg8[%c0_19, %c0_20] : memref<16x128xf32, #tpu.memory_space<vmem>>, vector<16x128xf32>
    tpu.vector_store %arg8[%c0_19, %c0_20], %31 {strides = array<i32>} : memref<16x128xf32, #tpu.memory_space<vmem>>, vector<16x128xf32>,
    return
  }
  func.func @transform_0(%arg0: i32) -> (i32, i32) {
    %c0_i32 = arith.constant 0 : i32
    %c0_i32_0 = arith.constant 0 : i32
    return %arg0, %c0_i32 : i32, i32
  }
  func.func @transform_1(%arg0: i32) -> (i32, i32) {
    %c0_i32 = arith.constant 0 : i32
    %c0_i32_0 = arith.constant 0 : i32
    %c0_i32_1 = arith.constant 0 : i32
    return %c0_i32, %c0_i32_0 : i32, i32
  }
  func.func @transform_2(%arg0: i32) -> (i32, i32) {
    %c0_i32 = arith.constant 0 : i32
    %c0_i32_0 = arith.constant 0 : i32
    %c0_i32_1 = arith.constant 0 : i32
    return %c0_i32, %c0_i32_0 : i32, i32
  }
  func.func @transform_3(%arg0: i32) -> (i32, i32) {
    %c0_i32 = arith.constant 0 : i32
    %c0_i32_0 = arith.constant 0 : i32
    %c0_i32_1 = arith.constant 0 : i32
    return %c0_i32, %c0_i32_0 : i32, i32
  }
  func.func @transform_4(%arg0: i32) -> (i32, i32) {
    %c0_i32 = arith.constant 0 : i32
    %c0_i32_0 = arith.constant 0 : i32
    %c0_i32_1 = arith.constant 0 : i32
    return %c0_i32, %c0_i32_0 : i32, i32
  }
  func.func @transform_5(%arg0: i32) -> (i32, i32) {
    %c0_i32 = arith.constant 0 : i32
    %c0_i32_0 = arith.constant 0 : i32
    %c0_i32_1 = arith.constant 0 : i32
    return %c0_i32, %c0_i32_0 : i32, i32
  }
  func.func @transform_6(%arg0: i32) -> (i32, i32) {
    %c0_i32 = arith.constant 0 : i32
    %c0_i32_0 = arith.constant 0 : i32
    %c0_i32_1 = arith.constant 0 : i32
    return %c0_i32, %c0_i32_0 : i32, i32
  }
  func.func @transform_7(%arg0: i32) -> (i32, i32) {
    %c0_i32 = arith.constant 0 : i32
    %c0_i32_0 = arith.constant 0 : i32
    return %arg0, %c0_i32 : i32, i32
  }
}

</mosaic_0001>

<bundles_post_ra>
// kernel: tpu_custom_call.1
= control target key start
LH: loop header
LB: loop body
LE: loop exit
PB: predicated region body
PF: predicated region fallthrough
CT: control target
= control target key end

     0   :  { %v410_v1 = vmov 0.0   ;;  %vm411_vm0 = vmmov 0   ;;  %vm58_vm1 = vcmask 261120   ;;  %s509_s0 = inlined_call_operand.vmem [shape: bf16[16,32], index: 0, kind: input, shape index: {}]   ;;  %s510_s1 = inlined_call_operand.vmem [shape: bf16[32,64], index: 1, kind: input, shape index: {}]   ;;  %s511_s2 = inlined_call_operand.vmem [shape: f32[1,64], index: 2, kind: input, shape index: {}]   ;;  %s512_s3 = inlined_call_operand.vmem [shape: bf16[64,48], index: 3, kind: input, shape index: {}]   ;;  %s513_s4 = inlined_call_operand.vmem [shape: f32[1,48], index: 4, kind: input, shape index: {}]   ;;  %s514_s5 = inlined_call_operand.vmem [shape: bf16[48,128], index: 5, kind: input, shape index: {}]   ;;  %s515_s6 = inlined_call_operand.vmem [shape: f32[1,128], index: 6, kind: input, shape index: {}]   ;;  %s516_s7 = inlined_call_operand.hbm [shape: f32[16,128], index: 7, kind: output, shape index: {}]  }
   0x1   :  { %v368_v0 = vld [vmem:[%s510_s1] sm:$0xff]   ;;  %333 = vmatprep.subr.bf16.mxu0 %v410_v1  ;;  %341 = vmatprep.subr.bf16.mxu1 %v410_v1  ;;  %v369_v2 = vld [vmem:[%s510_s1 + $0x8] sm:$0xff]  }
   0x2   :  { %334 = vmatpush3.bf16.msra.mxu0 %v368_v0  ;;  %337 = vmatprep.mubr.msk.bf16.mxu0 %vm411_vm0, %v410_v1  ;;  %v371_v3 = vld [vmem:[%s512_s3] sm:$0xff]   ;;  %v372_v5 = vld [vmem:[%s512_s3 + $0x8] sm:$0xff]  }
   0x3   :  { %335 = vmatprep.subr.bf16.mxu0 %v410_v1  ;;  %349 = vmatprep.mubr.msk.bf16.mxu1 %vm411_vm0, %v410_v1  ;;  %v370_v4 = vld [vmem:[%s509_s0] sm:$0xff]  }
   0x4   :  { %342 = vmatpush3.bf16.msra.mxu1 %v371_v3 }
   0x5   :  { %343 = vmatprep.subr.bf16.mxu1 %v410_v1 }
   0x6   :  { %336 = vmatpush3.bf16.msra.mxu0 %v369_v2 }
   0x7   :  { %353 = vmatprep.subr.bf16.mxu0 %v410_v1 }
   0x8   :  { %12 = vsyncpa [#allocation3], 0  ;;  %344 = vmatpush3.bf16.msra.mxu1 %v372_v5  ;;  %v373_v6 = vld [vmem:[%s512_s3 + $0x10] sm:$0xff]   ;;  %v374_v7 = vld [vmem:[%s512_s3 + $0x18] sm:$0xff]   ;;  %vm145_vm2 = vcmask 523264   ;;  %vm224_vm3 = vcmask 392192  }
   0x9   :  { %338 = vmatmul.mubr.msk.bf16.vlgmr.msra.gmra.mrb[0].mxu0 %vm58_vm1, %v370_v4  ;;  %345 = vmatprep.subr.bf16.mxu1 %v410_v1  ;;  %v375_v8 = vld [vmem:[%s514_s5] sm:$0xff]   ;;  %v376_v19 = vld [vmem:[%s514_s5 + $0x8] sm:$0xff]   ;;  %v377_v20 = vld [vmem:[%s514_s5 + $0x10] sm:$0xff]  }
   0xa   :  { %359 = vmatprep.mubr.msk.bf16.mxu0 %vm411_vm0, %v410_v1  ;;  %354 = vmatpush3.bf16.msra.mxu0 %v375_v8  ;;  %v305_v9 = vld [vmem:[%s511_s2] ss:$0 sm:$0xff] }
   0xb   :  { %355 = vmatprep.subr.bf16.mxu0 %v410_v1  ;;  %v310_v21 = vld [vmem:[%s513_s4] ss:$0 sm:$0xff]  ;;  %s412_s4 = smov [#allocation2]  }
   0xc   :  { %346 = vmatpush3.bf16.msra.mxu1 %v373_v6  ;;  %v316_v31 = vld [vmem:[%s515_s6] ss:$0 sm:$0xff]  ;;  %s294_s5 = sshll.u32 %s412_s4, 4  ;;  %s295_s5 = int_to_ptr.vmem [resolvable:$true] %s294_s5 }
   0xd   :  { %347 = vmatprep.subr.bf16.mxu1 %v410_v1  ;;  %s386_s6 = scalar_lea.vmem %s295_s5, 256  ;;  %p391_p1 = scmp.lt.s32.totalorder %s295_s5, %s295_s5 }
   0xe   :  { %356 = vmatpush3.bf16.msra.mxu0 %v376_v19  ;;  %p387_p0 = scmp.ne.s32.totalorder %s295_s5, %s386_s6  ;;  %p392_p2 = scmp.lt.s32.totalorder %s386_s6, %s386_s6 }
   0xf   :  { %357 = vmatprep.subr.bf16.mxu0 %v410_v1 }
  0x10   :  { %348 = vmatpush3.bf16.msra.mxu1 %v374_v7  ;;  %p393_p3 = por %p392_p2, %p391_p1 }
  0x12   :  { %358 = vmatpush3.bf16.msra.mxu0 %v377_v20  ;;  %p394_p4 = pnand %p393_p3, %p387_p0 }
  0xdc   :  { %v96_v10 = vpop.f32.mrb[0].mxu0 }
  0xdd   :  { %v97_v11 = vadd.f32 %v305_v9, %v96_v10  ;;  %v339_v12 = vpop.f32.mrb[1].mxu0 }
  0xde   :  { %v99_v13 = vpop.f32.mrb[2].mxu0 }
  0xdf   :  { %v100_v14 = vadd.f32 %v305_v9, %v99_v13  ;;  %v340_v15 = vpop.f32.mrb[3].mxu0  ;;  %v103_v16 = vmax.f32 %v97_v11, 0.0 }
  0xe1   :  { %v104_v17 = vmax.f32 %v100_v14, 0.0 }
  0xe3   :  { %v105_v18 = vpack.c.bf16 %v104_v17, %v103_v16 }
  0xe5   :  { %350 = vmatmul.mubr.msk.bf16.vlgmr.msra.gmra.mrb[0].mxu1 %vm145_vm2, %v105_v18 }
 0x1b8   :  { %v183_v22 = vpop.f32.mrb[0].mxu1 }
 0x1b9   :  { %v184_v23 = vadd.f32 %v310_v21, %v183_v22  ;;  %v351_v24 = vpop.f32.mrb[1].mxu1 }
 0x1ba   :  { %v186_v25 = vpop.f32.mrb[2].mxu1 }
 0x1bb   :  { %v187_v26 = vadd.f32 %v310_v21, %v186_v25  ;;  %v352_v27 = vpop.f32.mrb[3].mxu1  ;;  %v190_v28 = vmax.f32 %v184_v23, 0.0 }
 0x1bd   :  { %v191_v29 = vmax.f32 %v187_v26, 0.0 }
 0x1bf   :  { %v192_v30 = vpack.c.bf16 %v191_v29, %v190_v28 }
 0x1c1   :  { %360 = vmatmul.mubr.msk.bf16.vlgmr.msra.gmra.mrb[4].mxu0 %vm224_vm3, %v192_v30 }
 0x294   :  { %v262_v32 = vpop.f32.mrb[4].mxu0 }
 0x295   :  { %v263_v33 = vadd.f32 %v316_v31, %v262_v32  ;;  %v361_v34 = vpop.f32.mrb[5].mxu0 }
 0x296   :  { %v265_v35 = vpop.f32.mrb[6].mxu0 }
 0x297   :  { %269 = vmax.xlane.f32.xlu0 %v263_v33  ;;  %v362_v36 = vpop.f32.mrb[7].mxu0  ;;  %v266_v37 = vadd.f32 %v316_v31, %v265_v35 }
 0x29b   :  { %271 = vmax.xlane.f32.xlu0 %v266_v37 }
 0x324   :  { %v270_v38 = vpop.xlane.xlu0 %269 }
 0x325   :  { %v273_v39 = vsub.f32 %v263_v33, %v270_v38 }
 0x327   :  { %v275_v40 = vmul.f32 1.442695, %v273_v39 }
 0x328   :  { %v272_v41 = vpop.xlane.xlu0 %271 }
 0x329   :  { %378 = vpow2.f32 %v275_v40  ;;  %v274_v42 = vsub.f32 %v266_v37, %v272_v41 }
 0x32b   :  { %v277_v43 = vmul.f32 1.442695, %v274_v42 }
 0x32d   :  { %380 = vpow2.f32 %v277_v43 }
 0x333   :  { %v379_v44 = vpop.eup %378 }
 0x334   :  { %279 = vadd.xlane.f32.xlu1 %v379_v44 }
 0x337   :  { %v381_v45 = vpop.eup %380 }
 0x338   :  { %281 = vadd.xlane.f32.xlu1 %v381_v45 }
 0x3c1   :  { %v280_v46 = vpop.xlane.xlu1 %279 }
 0x3c2   :  { %382 = vrcp.f32 %v280_v46 }
 0x3c5   :  { %v282_v47 = vpop.xlane.xlu1 %281 }
 0x3c6   :  { %384 = vrcp.f32 %v282_v47 }
 0x3cc   :  { %v383_v48 = vpop.eup %382 }
 0x3cd   :  { %v285_v49 = vmul.f32 %v383_v48, %v379_v44 }
 0x3cf   :  { %287 = vst [vmem:[#allocation2] sm:$0xff] %v285_v49 }
 0x3d0   :  { %v385_v50 = vpop.eup %384 }
 0x3d1   :  { %v286_v51 = vmul.f32 %v385_v50, %v381_v45 }
 0x3d3   :  { %288 = vst [vmem:[#allocation2 + $0x8] sm:$0xff] %v286_v51 }
 0x3d4   :  { %397 = shalt.err (!%p394_p4)
}
 0x3d5   :  { %s398_s25 = scalar_lea.hbm %s516_s7, 256 }
 0x3d6   :  { %p399_p5 = scmp.ne.s32.totalorder %s516_s7, %s398_s25  ;;  %p402_p6 = scmp.lt.u32.totalorder %s398_s25, %s516_s7 }
 0x3d8   :  { %p404_p7 = pnand %p402_p6, %p399_p5 }
 0x3da   :  { %407 = shalt.err (!%p404_p7)
}
 0x3db   :  { %s413_s30 = smov 128   ;;  %s414_s8 = smov 8  }
 0x3dc   :  { %300 = dma.vmem_to_hbm [thread:$0]  %s295_s5, 256, %s516_s7, [#allocation3], %s413_s30, %s413_s30, %s414_s8  }
 0x3dd   :  { %408 = dma.done.wait [#allocation3], 256  }
 0x3de   :  { %409 = vsyncadd [#allocation3], 4294967040 }
 0x3df   :  { %304 = vsyncpa [#allocation3], 1 }

</bundles_post_ra>
